<compile_context>
chip_gen: v5e
topology: v5e:2x2
jax: 0.10.0
libtpu: 0.0.40
codegen_flags: <defaults>
</compile_context>

<pallas_src>
import jax
import jax.numpy as jnp
from jax.experimental import pallas as pl
from jax.experimental.pallas import tpu as pltpu


def cfg_guided_kernel(lam_ref,        # SMEM (1,1)  cond_lambda
                      x_ref,          # (D, tn)    bf16  [state; action; goal; sigma]^T
                      wstack_ref,     # (H+A, D)   f32   [w1^T ; guide state/goal rows]
                      b1_ref,         # (H, 1)     f32
                      w2_ref,         # (A, H)     f32
                      b2_ref,         # (A, 1)     f32
                      wgg_ref,        # (A, A)     f32   2*wg@wg^T
                      out_ref):       # (A, tn)    f32
    f32 = jnp.float32
    D = x_ref.shape[0]
    H = b1_ref.shape[0]

    # one VPU cast pass; every dot below accumulates in f32
    x = x_ref[...].astype(f32)                                            # (D, tn)

    # single stacked MXU pass:
    #   rows [0, H)   -> pre-tanh hidden activations (w1^T @ x^T)
    #   rows [H, H+A) -> state/goal contribution to the guide gradient
    z = jnp.dot(wstack_ref[...], x, preferred_element_type=f32)           # (H+A, tn)

    h = jnp.tanh(z[:H, :] + b1_ref[...])                                  # (H, tn)
    pred = jnp.dot(w2_ref[...], h, preferred_element_type=f32) + b2_ref[...]  # (A, tn)

    # folded analytic guide gradient: grads^T = Wgg@pred^T + Ws'@st^T + Wgoal'@go^T
    grads = jnp.dot(wgg_ref[...], pred, preferred_element_type=f32) + z[H:, :]

    # sigma**2 computed in-kernel from the sigma row of the slab (no extra stream)
    sig = x[D - 1:D, :]                                                   # (1, tn)
    out_ref[...] = pred + lam_ref[0, 0] * grads * (sig * sig)


def classifier_guided_sample(state, action, goal, sigma, params, cond_lambda=2.0):
    """state: (B,T,S)  action: (B,T,A)  goal: (B,T,G)  sigma: (B,)  -> (B,T,A)"""
    B, T, S = state.shape
    A = action.shape[-1]
    G = goal.shape[-1]
    H = params["w1"].shape[-1]
    D = S + A + G + 1
    N = B * T
    f32 = jnp.float32

    # ---- lane tiling: rows (B*T) live on the lane axis -> lane-dense output
    tn = min(1024, pl.cdiv(N, 128) * 128)
    if N > 128:
        # keep >= 2 grid steps when N permits so "parallel" can shard across
        # both TensorCores on v7x (harmless on single-TC v5e/v6e).
        tn = min(tn, max(128, pl.cdiv(N, 256) * 128))
    Np = pl.cdiv(N, tn) * tn
    pad = Np - N
    grid = (Np // tn,)

    # ---- single concat + cast + transpose (+pad) pass -> (D, Np) bf16 slab
    sig_col = jnp.broadcast_to(sigma[:, None], (B, T)).reshape(N, 1).astype(f32)
    x = jnp.concatenate(
        [state.reshape(N, S).astype(f32), action.reshape(N, A).astype(f32),
         goal.reshape(N, G).astype(f32), sig_col], axis=-1)                # (N, D)
    x_T = x.astype(jnp.bfloat16).T                                         # (D, N)
    if pad:
        x_T = jnp.pad(x_T, ((0, 0), (0, pad)))

    # ---- weight preprocessing (once per call, outside the hot loop)
    w1 = params["w1"].astype(f32)                       # (D, H)
    b1_T = params["b1"].astype(f32).T                   # (H, 1)
    w2_T = params["w2"].astype(f32).T                   # (A, H)
    b2_T = params["b2"].astype(f32).T                   # (A, 1)

    wg = params["wg"].astype(f32)
    ws = params["ws"].astype(f32)
    wgoal = params["wgoal"].astype(f32)
    # exact gradient of the quadratic guide, folded into weights
    wgg = 2.0 * (wg @ wg.T)                             # (A, A)
    wsg_T = 2.0 * (wg @ ws.T)                           # (A, S)
    wgog_T = 2.0 * (wg @ wgoal.T)                       # (A, G)
    guide_rows = jnp.concatenate(
        [wsg_T, jnp.zeros((A, A), f32), wgog_T, jnp.zeros((A, 1), f32)], axis=1)  # (A, D)
    wstack = jnp.concatenate([w1.T, guide_rows], axis=0)                   # (H+A, D)

    lam = jnp.full((1, 1), cond_lambda, f32)

    full_spec = lambda a: pl.BlockSpec(a.shape, lambda i: (0, 0))
    # TODO(synk): if the trace still shows exposed DMA after the tn bump, add
    # pipeline_mode=pl.Buffered(3) to the activation-slab BlockSpec below.
    in_specs = [
        pl.BlockSpec(memory_space=pltpu.MemorySpace.SMEM),   # cond_lambda scalar
        pl.BlockSpec((D, tn), lambda i: (0, i)),             # activation slab
        full_spec(wstack), full_spec(b1_T), full_spec(w2_T),
        full_spec(b2_T), full_spec(wgg),
    ]
    out_spec = pl.BlockSpec((A, tn), lambda i: (0, i))

    flops = 2 * Np * ((H + A) * D + A * H + A * A) + 6 * A * Np
    bytes_accessed = (D * Np * 2 + A * Np * 4
                      + 4 * (wstack.size + b1_T.size + w2_T.size + b2_T.size + wgg.size)
                      + 4)

    out_T = pl.pallas_call(
        cfg_guided_kernel,
        out_shape=jax.ShapeDtypeStruct((A, Np), f32),
        grid=grid,
        in_specs=in_specs,
        out_specs=out_spec,
        compiler_params=pltpu.CompilerParams(
            dimension_semantics=("parallel",),
            vmem_limit_bytes=32 * 1024 * 1024),
        cost_estimate=pl.CostEstimate(
            flops=int(flops),
            transcendentals=int(H * Np),
            bytes_accessed=int(bytes_accessed)),
    )(lam, x_T, wstack, b1_T, w2_T, b2_T, wgg)

    return out_T[:, :N].T.reshape(B, T, A)


def _reference(state, action, goal, sigma, params, cond_lambda=2.0):
    """Pure-JAX reference; jax.grad stands in for torch.autograd.grad."""
    B, T, S = state.shape
    sig_row = jnp.broadcast_to(sigma[:, None, None], (B, T, 1))
    x = jnp.concatenate([state, action, goal, sig_row], axis=-1)
    h = jnp.tanh(x @ params["w1"] + params["b1"])
    pred = h @ params["w2"] + params["b2"]

    def q_fn(a):
        z = a @ params["wg"] + state @ params["ws"] + goal @ params["wgoal"]
        return jnp.sum(z * z)

    grads = jax.grad(q_fn)(pred)
    return pred + cond_lambda * grads * (sigma[:, None, None] ** 2)


if __name__ == "__main__":
    B, T, S, A, G, H, HQ = 2, 8, 8, 4, 8, 32, 16
    D_IN = S + A + G + 1

    key = jax.random.PRNGKey(0)
    ks = jax.random.split(key, 11)
    params = {
        "w1":    jax.random.normal(ks[0], (D_IN, H), jnp.float32) * 0.1,
        "b1":    jax.random.normal(ks[1], (1, H), jnp.float32) * 0.01,
        "w2":    jax.random.normal(ks[2], (H, A), jnp.float32) * 0.1,
        "b2":    jax.random.normal(ks[3], (1, A), jnp.float32) * 0.01,
        "wg":    jax.random.normal(ks[4], (A, HQ), jnp.float32) * 0.1,
        "ws":    jax.random.normal(ks[5], (S, HQ), jnp.float32) * 0.1,
        "wgoal": jax.random.normal(ks[6], (G, HQ), jnp.float32) * 0.1,
    }

    state = jax.random.normal(ks[7], (B, T, S), jnp.float32)
    action = jax.random.normal(ks[8], (B, T, A), jnp.float32)
    goal = jax.random.normal(ks[9], (B, T, G), jnp.float32)
    sigma = jax.random.uniform(ks[10], (B,), jnp.float32, 0.1, 1.0)

    out = classifier_guided_sample(state, action, goal, sigma, params, cond_lambda=2.0)
    out = jax.block_until_ready(out)

    ref = _reference(state, action, goal, sigma, params, cond_lambda=2.0)
    assert out.shape == (B, T, A)
    # tolerance loosened vs. the pure-f32 version: activations are carried to
    # the kernel as bf16 (f32 accumulation everywhere).
    assert jnp.allclose(out, ref, atol=2e-2, rtol=2e-2), "kernel/reference mismatch"

    print("KERNEL_OK")
</pallas_src>

<mosaic_0001>
module attributes {stable_mosaic.version = 11 : i64} {
  func.func @cfg_guided_kernel(%arg0: i32, %arg1: memref<1x1xf32, #tpu.memory_space<smem>>, %arg2: memref<21x128xbf16, #tpu.memory_space<vmem>>, %arg3: memref<36x21xf32, #tpu.memory_space<vmem>>, %arg4: memref<32x1xf32, #tpu.memory_space<vmem>>, %arg5: memref<4x32xf32, #tpu.memory_space<vmem>>, %arg6: memref<4x1xf32, #tpu.memory_space<vmem>>, %arg7: memref<4x4xf32, #tpu.memory_space<vmem>>, %arg8: memref<4x128xf32, #tpu.memory_space<vmem>>) attributes {dimension_semantics = [#tpu.dimension_semantics<parallel>], iteration_bounds = array<i64: 1>, scalar_prefetch = 0 : i64, scratch_operands = 0 : i64, tpu.core_type = #tpu.core_type<tc>, window_params = [{transform_indices = @transform_0, window_bounds = array<i64: 1, 1>}, {transform_indices = @transform_1, window_bounds = array<i64: 21, 128>}, {pipeline_mode = #tpu.pipeline_mode<synchronous>, transform_indices = @transform_2, window_bounds = array<i64: 36, 21>}, {pipeline_mode = #tpu.pipeline_mode<synchronous>, transform_indices = @transform_3, window_bounds = array<i64: 32, 1>}, {pipeline_mode = #tpu.pipeline_mode<synchronous>, transform_indices = @transform_4, window_bounds = array<i64: 4, 32>}, {pipeline_mode = #tpu.pipeline_mode<synchronous>, transform_indices = @transform_5, window_bounds = array<i64: 4, 1>}, {pipeline_mode = #tpu.pipeline_mode<synchronous>, transform_indices = @transform_6, window_bounds = array<i64: 4, 4>}, {transform_indices = @transform_7, window_bounds = array<i64: 4, 128>}]} {
    %c0 = arith.constant 0 : index
    %c0_0 = arith.constant 0 : index
    %0 = vector.load %arg2[%c0, %c0_0] : memref<21x128xbf16, #tpu.memory_space<vmem>>, vector<21x128xbf16>
    %1 = arith.extf %0 : vector<21x128xbf16> to vector<21x128xf32>
    %c0_1 = arith.constant 0 : index
    %c0_2 = arith.constant 0 : index
    %2 = vector.load %arg3[%c0_1, %c0_2] : memref<36x21xf32, #tpu.memory_space<vmem>>, vector<36x21xf32>
    %cst = arith.constant dense<0.000000e+00> : vector<36x128xf32>
    %3 = tpu.matmul %2, %1, %cst {dimension_numbers = #tpu.dot_dimension_numbers<[1], [0], [0], [1], [0, 0, 1, 1], [], []>} : vector<36x21xf32>, vector<21x128xf32>, vector<36x128xf32> -> vector<36x128xf32>
    %4 = vector.extract_strided_slice %3 {offsets = [0, 0], sizes = [32, 128], strides = [1, 1]} : vector<36x128xf32> to vector<32x128xf32>
    %c0_3 = arith.constant 0 : index
    %c0_4 = arith.constant 0 : index
    %5 = vector.load %arg4[%c0_3, %c0_4] : memref<32x1xf32, #tpu.memory_space<vmem>>, vector<32x1xf32>
    %6 = vector.broadcast %5 : vector<32x1xf32> to vector<32x128xf32>
    %7 = arith.addf %4, %6 : vector<32x128xf32>
    %8 = math.tanh %7 : vector<32x128xf32>
    %c0_5 = arith.constant 0 : index
    %c0_6 = arith.constant 0 : index
    %9 = vector.load %arg5[%c0_5, %c0_6] : memref<4x32xf32, #tpu.memory_space<vmem>>, vector<4x32xf32>
    %cst_7 = arith.constant dense<0.000000e+00> : vector<4x128xf32>
    %10 = tpu.matmul %9, %8, %cst_7 {dimension_numbers = #tpu.dot_dimension_numbers<[1], [0], [0], [1], [0, 0, 1, 1], [], []>} : vector<4x32xf32>, vector<32x128xf32>, vector<4x128xf32> -> vector<4x128xf32>
    %c0_8 = arith.constant 0 : index
    %c0_9 = arith.constant 0 : index
    %11 = vector.load %arg6[%c0_8, %c0_9] : memref<4x1xf32, #tpu.memory_space<vmem>>, vector<4x1xf32>
    %12 = vector.broadcast %11 : vector<4x1xf32> to vector<4x128xf32>
    %13 = arith.addf %10, %12 : vector<4x128xf32>
    %c0_10 = arith.constant 0 : index
    %c0_11 = arith.constant 0 : index
    %14 = vector.load %arg7[%c0_10, %c0_11] : memref<4x4xf32, #tpu.memory_space<vmem>>, vector<4x4xf32>
    %cst_12 = arith.constant dense<0.000000e+00> : vector<4x128xf32>
    %15 = tpu.matmul %14, %13, %cst_12 {dimension_numbers = #tpu.dot_dimension_numbers<[1], [0], [0], [1], [0, 0, 1, 1], [], []>} : vector<4x4xf32>, vector<4x128xf32>, vector<4x128xf32> -> vector<4x128xf32>
    %16 = vector.extract_strided_slice %3 {offsets = [32, 0], sizes = [4, 128], strides = [1, 1]} : vector<36x128xf32> to vector<4x128xf32>
    %17 = arith.addf %15, %16 : vector<4x128xf32>
    %18 = vector.extract_strided_slice %1 {offsets = [20, 0], sizes = [1, 128], strides = [1, 1]} : vector<21x128xf32> to vector<1x128xf32>
    %c0_13 = arith.constant 0 : index
    %c0_14 = arith.constant 0 : index
    %19 = memref.load %arg1[%c0_13, %c0_14] : memref<1x1xf32, #tpu.memory_space<smem>>
    %20 = vector.broadcast %19 : f32 to vector<4x128xf32>
    %21 = arith.mulf %20, %17 : vector<4x128xf32>
    %22 = arith.mulf %18, %18 : vector<1x128xf32>
    %23 = vector.broadcast %22 : vector<1x128xf32> to vector<4x128xf32>
    %24 = arith.mulf %21, %23 : vector<4x128xf32>
    %25 = arith.addf %13, %24 : vector<4x128xf32>
    %c0_15 = arith.constant 0 : index
    %c0_16 = arith.constant 0 : index
    %26 = vector.load %arg8[%c0_15, %c0_16] : memref<4x128xf32, #tpu.memory_space<vmem>>, vector<4x128xf32>
    tpu.vector_store %arg8[%c0_15, %c0_16], %25 {strides = array<i32>} : memref<4x128xf32, #tpu.memory_space<vmem>>, vector<4x128xf32>,
    return
  }
  func.func @transform_0(%arg0: i32) -> (i32, i32) {
    %c0_i32 = arith.constant 0 : i32
    %c0_i32_0 = arith.constant 0 : i32
    %c0_i32_1 = arith.constant 0 : i32
    return %c0_i32, %c0_i32_0 : i32, i32
  }
  func.func @transform_1(%arg0: i32) -> (i32, i32) {
    %c0_i32 = arith.constant 0 : i32
    %c0_i32_0 = arith.constant 0 : i32
    return %c0_i32, %arg0 : i32, i32
  }
  func.func @transform_2(%arg0: i32) -> (i32, i32) {
    %c0_i32 = arith.constant 0 : i32
    %c0_i32_0 = arith.constant 0 : i32
    %c0_i32_1 = arith.constant 0 : i32
    return %c0_i32, %c0_i32_0 : i32, i32
  }
  func.func @transform_3(%arg0: i32) -> (i32, i32) {
    %c0_i32 = arith.constant 0 : i32
    %c0_i32_0 = arith.constant 0 : i32
    %c0_i32_1 = arith.constant 0 : i32
    return %c0_i32, %c0_i32_0 : i32, i32
  }
  func.func @transform_4(%arg0: i32) -> (i32, i32) {
    %c0_i32 = arith.constant 0 : i32
    %c0_i32_0 = arith.constant 0 : i32
    %c0_i32_1 = arith.constant 0 : i32
    return %c0_i32, %c0_i32_0 : i32, i32
  }
  func.func @transform_5(%arg0: i32) -> (i32, i32) {
    %c0_i32 = arith.constant 0 : i32
    %c0_i32_0 = arith.constant 0 : i32
    %c0_i32_1 = arith.constant 0 : i32
    return %c0_i32, %c0_i32_0 : i32, i32
  }
  func.func @transform_6(%arg0: i32) -> (i32, i32) {
    %c0_i32 = arith.constant 0 : i32
    %c0_i32_0 = arith.constant 0 : i32
    %c0_i32_1 = arith.constant 0 : i32
    return %c0_i32, %c0_i32_0 : i32, i32
  }
  func.func @transform_7(%arg0: i32) -> (i32, i32) {
    %c0_i32 = arith.constant 0 : i32
    %c0_i32_0 = arith.constant 0 : i32
    return %c0_i32, %arg0 : i32, i32
  }
}

</mosaic_0001>

<bundles_post_ra>
// kernel: tpu_custom_call.1
= control target key start
LH: loop header
LB: loop body
LE: loop exit
PB: predicated region body
PF: predicated region fallthrough
CT: control target
= control target key end

     0   :  { %vm55_vm0 = vcmask 1044480   ;;  %v265_v5 = vmov 0   ;;  %s367_s0 = inlined_call_operand.<no memory space> [shape: f32[1,1], index: 0, kind: input, shape index: {}]   ;;  %s368_s1 = inlined_call_operand.vmem [shape: bf16[21,128], index: 1, kind: input, shape index: {}]   ;;  %s369_s2 = inlined_call_operand.vmem [shape: f32[36,21], index: 2, kind: input, shape index: {}]   ;;  %s370_s3 = inlined_call_operand.vmem [shape: f32[32,1], index: 3, kind: input, shape index: {}]   ;;  %s371_s4 = inlined_call_operand.vmem [shape: f32[4,32], index: 4, kind: input, shape index: {}]   ;;  %s372_s5 = inlined_call_operand.vmem [shape: f32[4,1], index: 5, kind: input, shape index: {}]   ;;  %s373_s6 = inlined_call_operand.vmem [shape: f32[4,4], index: 6, kind: input, shape index: {}]   ;;  %s374_s7 = inlined_call_operand.hbm [shape: f32[4,128], index: 7, kind: output, shape index: {}]  }
   0x1   :  { %v30_v0 = vld [vmem:[%s368_s1 + $0x8] sm:$0x7]  ;;  %v217_v1 = vld [vmem:[%s368_s1] sm:$0xff]   ;;  %v94_v4 = vld [vmem:[%s370_s3 + $0x18] sm:$0xff]  ;;  %228 = vset.pattern.permute.xlu0 %v265_v5  ;;  %229 = vset.pattern.permute.xlu1 %v265_v5 }
   0x2   :  { %v313_v2 = vunpack.c.l.bf16 %v30_v0  ;;  %v219_v3 = vunpack.c.h.bf16 %v217_v1  ;;  %v218_v6 = vunpack.c.l.bf16 %v217_v1  ;;  %v92_v7 = vld [vmem:[%s370_s3 + $0x8] sm:$0xff] }
   0x4   :  { %207 = vmatpush.msk.msra.mxu0 %vm55_vm0, %v313_v2  ;;  %220 = vmatpush.msk.msra.mxu2 %vm55_vm0, %v313_v2 }
   0x5   :  { %13 = vsyncpa [#allocation4], 0  ;;  %221 = vmatpush.msk.msra.mxu3 %vm55_vm0, %v313_v2  ;;  %112 = vperm.xlu0 %228, %v94_v4   ;;  %v34_v8 = vld [vmem:[%s369_s2] sm:$0xff]  ;;  %vm39_vm1 = vcmask 171008   ;;  %v36_v9 = vld [vmem:[%s369_s2 + $0x10] sm:$0xff]  ;;  %vm130_vm2 = vcmask 261120   ;;  %v186_v37 = vmul.f32 %v313_v2, %v313_v2  ;;  %v184_v40 = vstv %s367_s0 }
   0x6   :  { %73 = vmatpush.msra.mxu0 %v219_v3  ;;  %222 = vmatpush.msra.mxu2 %v219_v3  ;;  %v37_v10 = vld [vmem:[%s369_s2 + $0x18] sm:$0xff]  ;;  %v93_v11 = vld [vmem:[%s370_s3 + $0x10] sm:$0xff]  ;;  %v91_v12 = vld [vmem:[%s370_s3] sm:$0xff]  ;;  %vm159_vm3 = vcmask 1043456   ;;  %vm155_vm4 = vcmask 31744   ;;  %s266_s26 = smov [#allocation3]  }
   0x7   :  { %223 = vmatpush.msra.mxu3 %v219_v3  ;;  %102 = vperm.xlu1 %229, %v92_v7   ;;  %v35_v13 = vld [vmem:[%s369_s2 + $0x8] sm:$0xff]  ;;  %v124_v14 = vld [vmem:[%s372_s5] sm:$0xf]  ;;  %v187_v42 = vperm.slane %v186_v37, 4  ;;  %s196_s27 = sshll.u32 %s266_s26, 4  ;;  %s197_s27 = int_to_ptr.vmem [resolvable:$true] %s196_s27 }
   0x8   :  { %74 = vmatpush.msra.mxu0 %v218_v6  ;;  %224 = vmatpush.msra.mxu2 %v218_v6  ;;  %v123_v30 = vld [vmem:[%s371_s4] sm:$0xf] }
   0x9   :  { %225 = vmatpush.msra.mxu3 %v218_v6  ;;  %208 = vmatmul.msk.f32.vlgmr.msra.gmra.mxu0 %vm39_vm1, %v34_v8  ;;  %v38_v32 = vld [vmem:[%s369_s2 + $0x20] sm:$0xf] }
   0xa   :  { %210 = vmatmul.msk.f32.vlgmr.msra.gmra.mxu2 %vm39_vm1, %v36_v9  ;;  %211 = vmatmul.msk.f32.vlgmr.msra.gmra.mxu3 %vm39_vm1, %v37_v10  ;;  %v154_v36 = vld [vmem:[%s373_s6] sm:$0xf]  ;;  %s198_s6 = sshll.u32 %s374_s7, 4  ;;  %s199_s6 = int_to_ptr.hbm [resolvable:$true] %s198_s6 }
   0xb   :  { %230 = vset.pattern.permute.xlu2 %v265_v5 }
   0xc   :  { %127 = vperm.xlu2 %230, %v124_v14  }
   0xd   :  { %107 = vperm.xlu0 %228, %v93_v11  }
   0xf   :  { %97 = vperm.xlu1 %229, %v91_v12  }
  0x11   :  { %209 = vmatmul.msk.f32.gmra.mxu0 %vm39_vm1, %v35_v13 }
  0x12   :  { %212 = vmatmul.msk.f32.gmra.mxu3 %vm39_vm1, %v38_v32 }
  0x66   :  { %v128_v33 = vpop.permute.xlu2 %127 }
  0x77   :  { %v113_v15 = vpop.permute.xlu0 %112 }
  0x79   :  { %v103_v16 = vpop.permute.xlu1 %102 }
  0x7f   :  { %v108_v20 = vpop.permute.xlu0 %107 }
  0x81   :  { %v98_v24 = vpop.permute.xlu1 %97 }
  0x86   :  { %v76_v17 = vpop.f32.mrf.mxu0 }
  0x87   :  { %v115_v26 = vadd.f32 %v98_v24, %v76_v17 }
  0x8d   :  { %v82_v18 = vpop.f32.mrf.mxu2  ;;  %v85_v19 = vpop.f32.mrf.mxu3 }
  0x8e   :  { %v118_v21 = vadd.f32 %v113_v15, %v85_v19  ;;  %v79_v22 = vpop.f32.mrf.mxu0  ;;  %v117_v23 = vadd.f32 %v108_v20, %v82_v18 }
  0x8f   :  { %v116_v25 = vadd.f32 %v103_v16, %v79_v22 }
  0x90   :  { %231 = vtanh.f32 %v118_v21 }
  0x91   :  { %233 = vtanh.f32 %v117_v23 }
  0x92   :  { %235 = vtanh.f32 %v116_v25 }
  0x93   :  { %237 = vtanh.f32 %v115_v26 }
  0x95   :  { %v88_v38 = vpop.f32.mrf.mxu3 }
  0x96   :  { %v232_v27 = vpop.eup %231 }
  0x97   :  { %146 = vmatpush.msra.mxu1 %v232_v27  ;;  %v234_v28 = vpop.eup %233 }
  0x98   :  { %v236_v29 = vpop.eup %235 }
  0x99   :  { %147 = vmatpush.msra.mxu1 %v234_v28  ;;  %v238_v31 = vpop.eup %237 }
  0x9b   :  { %148 = vmatpush.msra.mxu1 %v236_v29 }
  0x9d   :  { %149 = vmatpush.msra.mxu1 %v238_v31 }
  0x9e   :  { %213 = vmatmul.msk.f32.vlgmr.msra.gmra.mxu1 %vm130_vm2, %v123_v30 }
 0x11b   :  { %v151_v34 = vpop.f32.mrf.mxu1 }
 0x11c   :  { %v152_v35 = vadd.f32 %v151_v34, %v128_v33 }
 0x11e   :  { %214 = vmatpush.msk.msrb.mxu2 %vm159_vm3, %v152_v35 }
 0x11f   :  { %215 = vmatmul.msk.f32.vlgmr.msrb.gmra.mxu2 %vm155_vm4, %v154_v36 }
 0x1a2   :  { %v180_v39 = vpop.f32.mrf.mxu2 }
 0x1a3   :  { %v181_v41 = vadd.f32 %v180_v39, %v88_v38 }
 0x1a5   :  { %v185_v43 = vmul.f32 %v184_v40, %v181_v41 }
 0x1a7   :  { %v188_v44 = vmul.f32 %v187_v42, %v185_v43 }
 0x1a9   :  { %v189_v45 = vadd.f32 %v188_v44, %v152_v35 }
 0x1ab   :  { %190 = vst [vmem:[#allocation3] sm:$0xf] %v189_v45 }
 0x1ac   :  { %201 = dma.vmem_to_hbm [thread:$0]  %s197_s27, 64, %s199_s6, [#allocation4]  }
 0x1ad   :  { %263 = dma.done.wait [#allocation4], 64  }
 0x1ae   :  { %264 = vsyncadd [#allocation4], 4294967232 }
 0x1af   :  { %206 = vsyncpa [#allocation4], 1 }

</bundles_post_ra>
